<compile_context>
chip_gen: v5e
topology: v5e:2x2
jax: 0.10.0
libtpu: 0.0.40
codegen_flags: <defaults>
</compile_context>

<pallas_src>
from functools import partial

import numpy as np
import jax
import jax.numpy as jnp
from jax.experimental import pallas as pl
from jax.experimental.pallas import tpu as pltpu


# ---------------------------------------------------------------------------
# Table construction, faithful to PositionalEncoding.__init__.
# Verified against the PyTorch source: base is 1000 (not 10000); sin is applied
# to columns 0:2, then cos is applied to the *already-sin'd* column 1 (so
# col1 = cos(sin(x))); columns >= 2 keep the raw pos/1000^(2*(j//2)/d) values;
# a zero pad row is prepended.
# ---------------------------------------------------------------------------
def _build_pe_table_np(d_model, max_seq_len):
    pos = np.arange(max_seq_len, dtype=np.float64)[:, None]
    j = np.arange(d_model, dtype=np.float64)[None, :]
    table = pos / np.power(1000.0, 2.0 * np.floor(j / 2.0) / d_model)
    table[:, 0:2] = np.sin(table[:, 0:2])
    table[:, 1:2] = np.cos(table[:, 1:2])           # cos of the sin'd value, as in the reference
    table = np.concatenate([np.zeros((1, d_model)), table], axis=0)
    return table.astype(np.float32)                 # (max_seq_len + 1, d_model)


# ---------------------------------------------------------------------------
# Pallas kernel.
#   lens_ref : VMEM (TB, 1)                 int32   -- per-row sequence lengths
#   pe_ref   : VMEM (1, max_seq_len*D)      float32 -- flattened table rows 1.. (constant block)
#   out_ref  : VMEM (TB, max_len*D)         out_dtype
# out[b, i*D + d] = pe_flat[0, i*D + d] if i < len_b else 0, and
# (i < len_b)  <=>  (i*D + d) < len_b * D   for 0 <= d < D  -> single lane compare, no div.
# ---------------------------------------------------------------------------
def _pe_kernel(lens_ref, pe_ref, out_ref, *, d_model, flat_len):
    pe_row = pe_ref[:, pl.ds(0, flat_len)]                           # (1, flat_len), static prefix
    lane = jax.lax.broadcasted_iota(jnp.int32, (1, flat_len), 1)     # flat index i*D + d
    valid = lane < lens_ref[...] * d_model                           # (TB, flat_len) via broadcast
    out_ref[...] = jnp.where(valid, pe_row, 0.0).astype(out_ref.dtype)   # one bulk lane-dense store


def _choose_batch_tile(batch, row_bytes):
    """Batch rows per grid step: block dim must be a multiple of 8 or equal B."""
    if batch <= 8:
        return batch
    # Aim for ~512 KiB output blocks (near measured HBM roofline) while keeping
    # >= 2 grid steps so the two v7x TensorCores both get work (no-op on v5e/v6e).
    tb = min(batch // 2, max(8, (512 * 1024) // max(row_bytes, 1)))
    return max(8, (tb // 8) * 8)


@partial(jax.jit, static_argnames=("d_model", "max_len", "out_dtype"))
def _pe_lookup(pe_flat, lens, *, d_model, max_len, out_dtype):
    batch = lens.shape[0]
    flat_len = max_len * d_model
    out_itemsize = np.dtype(out_dtype).itemsize
    tb = _choose_batch_tile(batch, flat_len * out_itemsize)
    grid = (pl.cdiv(batch, tb),)

    out2d = pl.pallas_call(
        partial(_pe_kernel, d_model=d_model, flat_len=flat_len),
        out_shape=jax.ShapeDtypeStruct((batch, flat_len), out_dtype),
        grid=grid,
        in_specs=[
            pl.BlockSpec((tb, 1), lambda b: (b, 0)),           # lengths, (TB,1) per step
            pl.BlockSpec(pe_flat.shape, lambda b: (0, 0)),     # full flat table, fetched once
        ],
        out_specs=pl.BlockSpec((tb, flat_len), lambda b: (b, 0)),
        compiler_params=pltpu.CompilerParams(dimension_semantics=("parallel",)),
        cost_estimate=pl.CostEstimate(
            flops=2 * batch * flat_len,
            transcendentals=0,
            bytes_accessed=batch * flat_len * out_itemsize + int(pe_flat.size) * 4 + batch * 4,
        ),
    )(lens, pe_flat)
    # Free row-major reshape back to the module's output layout.
    return out2d.reshape(batch, max_len, d_model)


# ---------------------------------------------------------------------------
# Module-like wrapper mirroring the PyTorch class.
# ---------------------------------------------------------------------------
class PositionalEncoding:
    def __init__(self, d_model, max_seq_len):
        self.d_model = int(d_model)
        self.max_seq_len = int(max_seq_len)
        tbl = _build_pe_table_np(self.d_model, self.max_seq_len)
        self.pe_table = jnp.asarray(tbl)                                        # (max_seq_len+1, D)
        # Flattened pad-row-free copy prepared ONCE at init (a "registered buffer"),
        # so forward never re-slices / re-copies the table per call.
        self.pe_flat = jnp.asarray(tbl[1:].reshape(1, self.max_seq_len * self.d_model))

    def __call__(self, input_len, max_len=None, out_dtype=jnp.float32):
        """input_len: (B,) or (B,1) int lengths. Returns (B, max_len, d_model)."""
        if max_len is None:
            max_len = self.max_seq_len      # static padding bucket: one compile, async dispatch
        max_len = int(max_len)
        if not (1 <= max_len <= self.max_seq_len):
            raise ValueError(f"max_len={max_len} must lie in [1, {self.max_seq_len}]")
        lens = jnp.asarray(input_len, jnp.int32).reshape(-1, 1)
        return _pe_lookup(self.pe_flat, lens, d_model=self.d_model,
                          max_len=max_len, out_dtype=out_dtype)


# ---------------------------------------------------------------------------
if __name__ == "__main__":
    D_MODEL, MAX_SEQ_LEN, B = 32, 16, 4

    key = jax.random.PRNGKey(0)
    # lengths in [1, MAX_SEQ_LEN], shaped (B, 1) as in the reference docstring
    input_len = jax.random.randint(key, (B, 1), 1, MAX_SEQ_LEN + 1, dtype=jnp.int32)

    pe = PositionalEncoding(D_MODEL, MAX_SEQ_LEN)

    # (1) Default static bucket (max_len = max_seq_len): jittable, no host sync in forward.
    out_bucket = jax.block_until_ready(pe(input_len))

    # Pure-numpy reference mirroring the PyTorch forward exactly.
    lens_np = np.asarray(jax.device_get(input_len)).reshape(-1)
    ref_max = int(lens_np.max())
    table_np = np.asarray(jax.device_get(pe.pe_table))
    input_pos = np.array([list(range(1, int(l) + 1)) + [0] * (ref_max - int(l)) for l in lens_np])
    ref = table_np[input_pos]                                    # (B, ref_max, D)

    assert out_bucket.shape == (B, MAX_SEQ_LEN, D_MODEL)
    out_np = np.asarray(jax.device_get(out_bucket))
    np.testing.assert_allclose(out_np[:, :ref_max], ref, rtol=0.0, atol=0.0)
    np.testing.assert_allclose(out_np[:, ref_max:], 0.0, rtol=0.0, atol=0.0)

    # (2) Exact PyTorch output shape: pass the (statically known) max length explicitly.
    out_exact = jax.block_until_ready(pe(input_len, max_len=ref_max))
    assert out_exact.shape == (B, ref_max, D_MODEL)
    np.testing.assert_allclose(np.asarray(jax.device_get(out_exact)), ref, rtol=0.0, atol=0.0)

    print("KERNEL_OK")
</pallas_src>

<mosaic_0001>
module attributes {stable_mosaic.version = 11 : i64} {
  func.func @_pe_kernel(%arg0: i32, %arg1: memref<4x1xi32, #tpu.memory_space<vmem>>, %arg2: memref<1x512xf32, #tpu.memory_space<vmem>>, %arg3: memref<4x512xf32, #tpu.memory_space<vmem>>) attributes {dimension_semantics = [#tpu.dimension_semantics<parallel>], iteration_bounds = array<i64: 1>, scalar_prefetch = 0 : i64, scratch_operands = 0 : i64, tpu.core_type = #tpu.core_type<tc>, window_params = [{transform_indices = @transform_0, window_bounds = array<i64: 4, 1>}, {pipeline_mode = #tpu.pipeline_mode<synchronous>, transform_indices = @transform_1, window_bounds = array<i64: 1, 512>}, {transform_indices = @transform_2, window_bounds = array<i64: 4, 512>}]} {
    %c0 = arith.constant 0 : index
    %c0_0 = arith.constant 0 : index
    %0 = vector.load %arg2[%c0, %c0_0] : memref<1x512xf32, #tpu.memory_space<vmem>>, vector<1x512xf32>
    %1 = tpu.iota {dimensions = array<i32: 1>} : vector<1x512xi32>
    %c0_1 = arith.constant 0 : index
    %c0_2 = arith.constant 0 : index
    %2 = vector.load %arg1[%c0_1, %c0_2] : memref<4x1xi32, #tpu.memory_space<vmem>>, vector<4x1xi32>
    %c32_i32 = arith.constant 32 : i32
    %3 = vector.broadcast %c32_i32 : i32 to vector<4x1xi32>
    %4 = arith.muli %2, %3 : vector<4x1xi32>
    %5 = vector.broadcast %1 : vector<1x512xi32> to vector<4x512xi32>
    %6 = vector.broadcast %4 : vector<4x1xi32> to vector<4x512xi32>
    %7 = arith.cmpi slt, %5, %6 : vector<4x512xi32>
    %cst = arith.constant 0.000000e+00 : f32
    %8 = vector.shape_cast %0 : vector<1x512xf32> to vector<1x512xf32>
    %9 = vector.broadcast %8 : vector<1x512xf32> to vector<4x512xf32>
    %10 = vector.broadcast %cst : f32 to vector<4x512xf32>
    %11 = arith.select %7, %9, %10 : vector<4x512xi1>, vector<4x512xf32>
    %c0_3 = arith.constant 0 : index
    %c0_4 = arith.constant 0 : index
    %12 = vector.load %arg3[%c0_3, %c0_4] : memref<4x512xf32, #tpu.memory_space<vmem>>, vector<4x512xf32>
    tpu.vector_store %arg3[%c0_3, %c0_4], %11 {strides = array<i32>} : memref<4x512xf32, #tpu.memory_space<vmem>>, vector<4x512xf32>,
    return
  }
  func.func @transform_0(%arg0: i32) -> (i32, i32) {
    %c0_i32 = arith.constant 0 : i32
    %c0_i32_0 = arith.constant 0 : i32
    return %arg0, %c0_i32 : i32, i32
  }
  func.func @transform_1(%arg0: i32) -> (i32, i32) {
    %c0_i32 = arith.constant 0 : i32
    %c0_i32_0 = arith.constant 0 : i32
    %c0_i32_1 = arith.constant 0 : i32
    return %c0_i32, %c0_i32_0 : i32, i32
  }
  func.func @transform_2(%arg0: i32) -> (i32, i32) {
    %c0_i32 = arith.constant 0 : i32
    %c0_i32_0 = arith.constant 0 : i32
    return %arg0, %c0_i32 : i32, i32
  }
}

</mosaic_0001>

<bundles_post_ra>
// kernel: _pe_lookup.1
= control target key start
LH: loop header
LB: loop body
LE: loop exit
PB: predicated region body
PF: predicated region fallthrough
CT: control target
= control target key end

     0   :  { %v58_v0 = vmov 0   ;;  %v12_v3 = vlaneseq  ;;  %vm45_vm4 = vcmask 1043456   ;;  %s86_s0 = inlined_call_operand.vmem [shape: s32[4,1], index: 0, kind: input, shape index: {}]   ;;  %s87_s1 = inlined_call_operand.vmem [shape: f32[1,512], index: 1, kind: input, shape index: {}]   ;;  %s88_s2 = inlined_call_operand.vmem [shape: f32[4,512], index: 2, kind: output, shape index: {}]  }
   0x1   :  { %57 = vset.pattern.permute.xlu0 %v58_v0  ;;  %v17_v1 = vld [vmem:[%s86_s0] sm:$0xf] }
   0x2   :  { %v18_v2 = vmul.u32 32, %v17_v1  ;;  %v13_v4 = vand.u32 127, %v12_v3  ;;  %v11_v5 = vld [vmem:[%s87_s1] sm:$0xf] }
   0x3   :  { %v28_v9 = vperm.slane %v11_v5, 1  ;;  %v30_v10 = vperm.slane %v11_v5, 3  ;;  %v27_v11 = vperm.slane %v11_v5, 0  ;;  %v29_v12 = vperm.slane %v11_v5, 2 }
   0x4   :  { %20 = vperm.xlu0 %57, %v18_v2   ;;  %v14_v6 = vadd.s32 128, %v13_v4  ;;  %v15_v7 = vadd.s32 256, %v13_v4  ;;  %v16_v8 = vadd.s32 384, %v13_v4 }
  0x76   :  { %v21_v13 = vpop.permute.xlu0 %20 }
  0x77   :  { %vm22_vm0 = vcmp.lt.s32.totalorder %v13_v4, %v21_v13  ;;  %vm23_vm1 = vcmp.lt.s32.totalorder %v14_v6, %v21_v13  ;;  %vm24_vm2 = vcmp.lt.s32.totalorder %v15_v7, %v21_v13  ;;  %vm25_vm3 = vcmp.lt.s32.totalorder %v16_v8, %v21_v13 }
  0x78   :  { %v36_v14 = vsel %vm23_vm1, %v28_v9, 0.0  ;;  %v38_v15 = vsel %vm25_vm3, %v30_v10, 0.0  ;;  %v35_v18 = vsel %vm22_vm0, %v27_v11, 0.0  ;;  %v37_v19 = vsel %vm24_vm2, %v29_v12, 0.0 }
  0x79   :  { %v43_v16 = vrot.slane %v36_v14, 4  ;;  %v44_v17 = vrot.slane %v38_v15, 4 }
  0x7b   :  { %v46_v20 = vsel %vm45_vm4, %v35_v18, %v43_v16  ;;  %v47_v21 = vsel %vm45_vm4, %v37_v19, %v44_v17 }
  0x7c   :  { %50 = vst [vmem:[%s88_s2] sm:$0xff] %v46_v20 }
  0x7d   :  { %51 = vst [vmem:[%s88_s2 + $0x8] sm:$0xff] %v47_v21 }

</bundles_post_ra>
